<compile_context>
chip_gen: v6e
topology: v6e:2x2x1
jax: 0.10.0
libtpu: 0.0.40
codegen_flags: <defaults>
</compile_context>

<pallas_src>
import functools
import math

import jax
import jax.numpy as jnp
from jax.experimental import pallas as pl
from jax.experimental.pallas import tpu as pltpu


PE_RESIDENT_MAX_BYTES = 2 << 20   # keep the whole (seq-sliced) pe slab in VMEM below this


# ----------------------------------------------------------------------------
# Parameter setup (plain JAX glue; mirrors the PyTorch __init__ exactly).
# ----------------------------------------------------------------------------
def build_pe(input_size: int, max_len: int = 5000, dtype=jnp.float32) -> jnp.ndarray:
    """Positional-encoding buffer; odd slots use cos(position * div_term_odd),
    exponent scaled by 1/input_size — exactly like the reference module.
    Cast to the model dtype once here (hoists the convert out of forward)."""
    position = jnp.arange(0, max_len, dtype=jnp.float32)[:, None]          # (L, 1)
    even_idx = jnp.arange(0, input_size, 2, dtype=jnp.float32)             # ceil(D/2)
    odd_idx = jnp.arange(1, input_size, 2, dtype=jnp.float32)              # floor(D/2)
    div_even = jnp.exp(even_idx * -(math.log(10000.0) / input_size))
    div_odd = jnp.exp(odd_idx * -(math.log(10000.0) / input_size))
    pe = jnp.zeros((max_len, input_size), dtype=jnp.float32)
    pe = pe.at[:, 0::2].set(jnp.sin(position * div_even))
    pe = pe.at[:, 1::2].set(jnp.cos(position * div_odd))
    return pe.astype(dtype)


# ----------------------------------------------------------------------------
# Kernels
# ----------------------------------------------------------------------------
def _add_pe_stream_kernel(x_ref, pe_ref, o_ref):
    # x_ref: activation tile; pe_ref: broadcast-compatible pe tile (streamed).
    o_ref[...] = (x_ref[...] + pe_ref[...]).astype(o_ref.dtype)


def _add_pe_resident_kernel(x_ref, pe_ref, o_ref, *, rows_per_block, pe_blocks):
    # pe_ref holds the whole seq-sliced pe table in VMEM (constant index_map
    # -> fetched from HBM once); pick this step's rows with a sublane-dim
    # dynamic slice (cheap, well supported).
    blk = pl.program_id(0) % pe_blocks
    off = blk * rows_per_block
    if rows_per_block > 1:
        off = pl.multiple_of(off, rows_per_block)
    pe_tile = pe_ref[pl.ds(off, rows_per_block), :]
    o_ref[...] = (x_ref[...] + pe_tile).astype(o_ref.dtype)


# ----------------------------------------------------------------------------
# Tiling heuristics
# ----------------------------------------------------------------------------
def _sublane_pack(itemsize: int) -> int:
    return {4: 8, 2: 16, 1: 32}.get(itemsize, 8)


def _round_down_to_multiple(v: int, m: int) -> int:
    return max(m, (v // m) * m)


def _default_target_block_bytes() -> int:
    """Per-generation block-size knob: roomier blocks on 128-MiB-VMEM chips
    (v5e/v6e), tighter on v7x (64 MiB).  Falls back safely if the query fails."""
    try:
        vmem = getattr(pltpu.get_tpu_info(), "vmem_capacity_bytes", None)
        if vmem is not None and vmem >= (96 << 20):
            return 8 << 20
    except Exception:
        pass
    return 6 << 20


def _vmem_limit_bytes(block_bytes, slack=4 << 20, cap=96 << 20) -> int:
    """Scoped-VMEM limit derived from the actual double-buffered footprint."""
    return int(min(cap, max(8 << 20, 2 * sum(block_bytes) + slack)))


def _choose_flat_tile(n, batch, itemsize, target_bytes, min_steps=2):
    """Lane tile along the flattened S*D axis: a multiple of 128 (when possible)
    sized so batch*tile*itemsize ~= target_bytes, preferring a tile that
    divides n (no ragged last block) and leaves >= min_steps grid steps."""
    if n <= 128:
        return n
    target = _round_down_to_multiple(target_bytes // max(1, batch * itemsize), 128)
    if n >= 128 * min_steps:
        target = min(target, _round_down_to_multiple(n // min_steps, 128))
    target = min(target, n)
    if n % 128 != 0:
        return target
    n_units = n // 128
    t_units = max(1, target // 128)
    best = 1
    i = 1
    while i * i <= n_units:
        if n_units % i == 0:
            for q in (i, n_units // i):
                if q <= t_units and q > best:
                    best = q
        i += 1
    return best * 128


def _choose_row_tile(batch, seq, d, itemsize, sublane, target_bytes, min_steps=2):
    """Row tile for the (B*S, D) layout: a divisor of `seq` that is a multiple
    of the sublane packing, sized toward target_bytes per block with >= min_steps
    grid steps.  Caller guarantees seq % sublane == 0."""
    bytes_per_row = max(1, d * itemsize)
    target_rows = max(sublane, target_bytes // bytes_per_row)
    total_rows = batch * seq
    if total_rows >= sublane * min_steps:
        target_rows = min(target_rows, max(sublane, total_rows // min_steps))
    units = seq // sublane
    best = 1
    i = 1
    while i * i <= units:
        if units % i == 0:
            for q in (i, units // i):
                if q * sublane <= target_rows and q > best:
                    best = q
        i += 1
    return best * sublane


# ----------------------------------------------------------------------------
# Forward
# ----------------------------------------------------------------------------
def positional_encoding_forward(x: jnp.ndarray, pe: jnp.ndarray, *,
                                target_block_bytes=None,
                                donate_x: bool = False) -> jnp.ndarray:
    """x: (B, S, D); pe: (max_len, D) (ideally already in x.dtype).
    Returns x + pe[:S, :], broadcast over batch."""
    b, s, d = x.shape
    if s > pe.shape[0]:
        raise ValueError(f"seq_len {s} exceeds positional-encoding max_len {pe.shape[0]}")
    if pe.shape[1] != d:
        raise ValueError(f"pe feature dim {pe.shape[1]} != input feature dim {d}")

    dtype = x.dtype
    itemsize = jnp.dtype(dtype).itemsize
    if pe.dtype != dtype:
        # NOTE: for exact f32-accumulation parity with PyTorch on reduced-precision
        # inputs, keep pe in f32 and upcast the x tile in-kernel instead (2x pe
        # traffic). Default: match model dtype; caller should build pe pre-cast
        # (build_pe(dtype=...)) so this convert never runs in the hot path.
        pe = pe.astype(dtype)

    if target_block_bytes is None:
        target_block_bytes = _default_target_block_bytes()

    sublane = _sublane_pack(itemsize)
    pe_s = pe[:s, :]            # free row-major prefix view
    min_steps = 2               # let v7x's two TensorCores both get work
    io_alias = {0: 0} if donate_x else {}

    use_rows = (b < sublane) and (d % 128 == 0) and (s % sublane == 0)

    if use_rows:
        # Small batch: (B*S, D) keeps sublanes full; pe broadcasts across batch
        # via the index_map (re-read once per batch element).
        rows = b * s
        x2 = x.reshape(rows, d)
        row_tile = _choose_row_tile(b, s, d, itemsize, sublane,
                                    target_block_bytes, min_steps)
        seq_blocks = s // row_tile
        grid = (rows // row_tile,)
        blk_bytes = row_tile * d * itemsize

        if s * d * itemsize <= PE_RESIDENT_MAX_BYTES:
            kernel = functools.partial(_add_pe_resident_kernel,
                                       rows_per_block=row_tile,
                                       pe_blocks=seq_blocks)
            pe_spec = pl.BlockSpec((s, d), lambda i: (0, 0))
            pe_bytes = s * d * itemsize
        else:
            kernel = _add_pe_stream_kernel
            pe_spec = pl.BlockSpec((row_tile, d), lambda i: (i % seq_blocks, 0))
            pe_bytes = blk_bytes

        out = pl.pallas_call(
            kernel,
            out_shape=jax.ShapeDtypeStruct((rows, d), dtype),
            grid=grid,
            in_specs=[pl.BlockSpec((row_tile, d), lambda i: (i, 0)), pe_spec],
            out_specs=pl.BlockSpec((row_tile, d), lambda i: (i, 0)),
            input_output_aliases=io_alias,
            compiler_params=pltpu.CompilerParams(
                dimension_semantics=("parallel",),
                vmem_limit_bytes=_vmem_limit_bytes([blk_bytes, blk_bytes, pe_bytes])),
        )(x2, pe_s)
        return out.reshape(b, s, d)

    # Default flat layout: (S, D) flattened onto lanes, batch on sublanes
    # (full sublanes when B >= 8/16/32); pe read from HBM exactly once.
    n = s * d
    x2 = x.reshape(b, n)
    pe2 = pe_s.reshape(1, n)
    tile = _choose_flat_tile(n, b, itemsize, target_block_bytes, min_steps)
    steps = -(-n // tile)
    grid = (steps,)
    x_blk_bytes = b * tile * itemsize

    if (n % tile == 0) and (n * itemsize <= PE_RESIDENT_MAX_BYTES):
        # Whole pe slab resident in VMEM, one sublane row per grid step.
        kernel = functools.partial(_add_pe_resident_kernel,
                                   rows_per_block=1, pe_blocks=steps)
        pe_arg = pe2.reshape(steps, tile)
        pe_spec = pl.BlockSpec((steps, tile), lambda i: (0, 0))
        pe_bytes = n * itemsize
    else:
        kernel = _add_pe_stream_kernel
        pe_arg = pe2
        pe_spec = pl.BlockSpec((1, tile), lambda i: (0, i))
        pe_bytes = tile * itemsize

    out = pl.pallas_call(
        kernel,
        out_shape=jax.ShapeDtypeStruct((b, n), dtype),
        grid=grid,
        in_specs=[pl.BlockSpec((b, tile), lambda i: (0, i)), pe_spec],
        out_specs=pl.BlockSpec((b, tile), lambda i: (0, i)),
        input_output_aliases=io_alias,
        compiler_params=pltpu.CompilerParams(
            dimension_semantics=("parallel",),
            vmem_limit_bytes=_vmem_limit_bytes([x_blk_bytes, x_blk_bytes, pe_bytes])),
    )(x2, pe_arg)
    return out.reshape(b, s, d)


if __name__ == "__main__":
    key = jax.random.PRNGKey(0)

    # Case 1: module-sized example (flat layout, VMEM-resident pe, 2 grid steps).
    batch, seq, hidden = 2, 8, 32
    pe = build_pe(hidden, max_len=64)                         # small max_len; same semantics as 5000
    x = jax.random.normal(key, (batch, seq, hidden), dtype=jnp.float32)
    out = jax.block_until_ready(positional_encoding_forward(x, pe))
    ref = x + pe[:seq, :][None, :, :]
    assert out.shape == (batch, seq, hidden)
    assert jnp.allclose(out, ref, atol=1e-6), "case 1 mismatch vs reference"

    # Case 2: small batch + 128-aligned feature dim -> rows (B*S, D) layout
    # (full sublanes when B < 8).
    b2, s2, d2 = 2, 16, 128
    pe_b = build_pe(d2, max_len=64)
    x_b = jax.random.normal(jax.random.PRNGKey(0), (b2, s2, d2), dtype=jnp.float32)
    out_b = jax.block_until_ready(positional_encoding_forward(x_b, pe_b))
    ref_b = x_b + pe_b[:s2, :][None, :, :]
    assert jnp.allclose(out_b, ref_b, atol=1e-6), "case 2 mismatch vs reference"

    # Case 3: non-128-aligned flattened extent -> streamed pe + ragged last block.
    b3, s3, d3 = 2, 8, 40
    pe_c = build_pe(d3, max_len=64)
    x_c = jax.random.normal(jax.random.PRNGKey(0), (b3, s3, d3), dtype=jnp.float32)
    out_c = jax.block_until_ready(positional_encoding_forward(x_c, pe_c))
    ref_c = x_c + pe_c[:s3, :][None, :, :]
    assert jnp.allclose(out_c, ref_c, atol=1e-6), "case 3 mismatch vs reference"

    print("KERNEL_OK")
</pallas_src>

<mosaic_0001>
module attributes {stable_mosaic.version = 11 : i64} {
  func.func @_add_pe_resident_kernel(%arg0: i32, %arg1: memref<2x128xf32, #tpu.memory_space<vmem>>, %arg2: memref<2x128xf32, #tpu.memory_space<vmem>>, %arg3: memref<2x128xf32, #tpu.memory_space<vmem>>) attributes {dimension_semantics = [#tpu.dimension_semantics<parallel>], iteration_bounds = array<i64: 2>, scalar_prefetch = 0 : i64, scratch_operands = 0 : i64, tpu.core_type = #tpu.core_type<tc>, window_params = [{transform_indices = @transform_0, window_bounds = array<i64: 2, 128>}, {pipeline_mode = #tpu.pipeline_mode<synchronous>, transform_indices = @transform_1, window_bounds = array<i64: 2, 128>}, {transform_indices = @transform_2, window_bounds = array<i64: 2, 128>}]} {
    %c2_i32 = arith.constant 2 : i32
    %c0_i32 = arith.constant 0 : i32
    %0 = arith.cmpi eq, %c2_i32, %c0_i32 : i32
    %c1_i32 = arith.constant 1 : i32
    %1 = arith.select %0, %c1_i32, %c2_i32 : i32
    %2 = arith.remsi %arg0, %1 : i32
    %c0_i32_0 = arith.constant 0 : i32
    %3 = arith.cmpi ne, %2, %c0_i32_0 : i32
    %c0_i32_1 = arith.constant 0 : i32
    %4 = arith.cmpi slt, %2, %c0_i32_1 : i32
    %c0_i32_2 = arith.constant 0 : i32
    %5 = arith.cmpi slt, %1, %c0_i32_2 : i32
    %6 = arith.xori %4, %5 : i1
    %7 = arith.andi %6, %3 : i1
    %8 = arith.addi %2, %1 : i32
    %9 = arith.select %7, %8, %2 : i32
    %c1_i32_3 = arith.constant 1 : i32
    %10 = arith.muli %9, %c1_i32_3 : i32
    %11 = arith.index_cast %10 : i32 to index
    %c0 = arith.constant 0 : index
    %12 = vector.load %arg2[%11, %c0] : memref<2x128xf32, #tpu.memory_space<vmem>>, vector<1x128xf32>
    %c0_4 = arith.constant 0 : index
    %c0_5 = arith.constant 0 : index
    %13 = vector.load %arg1[%c0_4, %c0_5] : memref<2x128xf32, #tpu.memory_space<vmem>>, vector<2x128xf32>
    %14 = vector.broadcast %12 : vector<1x128xf32> to vector<2x128xf32>
    %15 = arith.addf %13, %14 : vector<2x128xf32>
    %c0_6 = arith.constant 0 : index
    %c0_7 = arith.constant 0 : index
    %16 = vector.load %arg3[%c0_6, %c0_7] : memref<2x128xf32, #tpu.memory_space<vmem>>, vector<2x128xf32>
    tpu.vector_store %arg3[%c0_6, %c0_7], %15 {strides = array<i32>} : memref<2x128xf32, #tpu.memory_space<vmem>>, vector<2x128xf32>,
    return
  }
  func.func @transform_0(%arg0: i32) -> (i32, i32) {
    %c0_i32 = arith.constant 0 : i32
    %c0_i32_0 = arith.constant 0 : i32
    return %c0_i32, %arg0 : i32, i32
  }
  func.func @transform_1(%arg0: i32) -> (i32, i32) {
    %c0_i32 = arith.constant 0 : i32
    %c0_i32_0 = arith.constant 0 : i32
    %c0_i32_1 = arith.constant 0 : i32
    return %c0_i32, %c0_i32_0 : i32, i32
  }
  func.func @transform_2(%arg0: i32) -> (i32, i32) {
    %c0_i32 = arith.constant 0 : i32
    %c0_i32_0 = arith.constant 0 : i32
    return %c0_i32, %arg0 : i32, i32
  }
}

</mosaic_0001>

<bundles_post_ra>
// kernel: tpu_custom_call.1
= control target key start
LH: loop header
LB: loop body
LE: loop exit
PB: predicated region body
PF: predicated region fallthrough
CT: control target
= control target key end

     0   :  { %7 = vsyncpa [#allocation3], 0  ;;  %s680_s0 = inlined_call_operand.hbm [shape: f32[2,256], index: 0, kind: input, shape index: {}]   ;;  %s681_s1 = inlined_call_operand.hbm [shape: f32[2,128], index: 1, kind: input, shape index: {}]   ;;  %s682_s2 = inlined_call_operand.hbm [shape: f32[2,256], index: 2, kind: output, shape index: {}]  }
   0x1   :  { %9 = vsyncpa [#allocation3 + $0x1], 0 }
   0x2   :  { %10 = vsyncpa [#allocation6], 0 }
   0x3   :  { %11 = vsyncpa [#allocation4], 0 }
   0x4   :  { %13 = vsyncpa [#allocation4 + $0x1], 0  ;;  %s505_s9 = smov 0   ;;  %s507_s10 = smov 0  }
   0x5   :  { %s509_s11 = smov 0   ;;  %s511_s12 = smov 0  }
   0x6 LB: > { %s526_s13 = sadd.s32 4294967295, %s485_s12   ;;  %s288_s14 = sadd.s32 4294967294, %s485_s12   ;;  %s485_s12 = sphi %s511_s12, %s705_s12   ;;  %s481_s11 = sphi %s509_s11, %s704_s11   ;;  %s477_s10 = sphi %s507_s10, %s703_s10   ;;  %s473_s9 = sphi %s505_s9, %s702_s9  }
   0x7   : > { %p39_p0 = scmp.ne.s32.totalorder %s477_s10, %s473_s9  ;;  %p683_p1 = scmp.eq.s32.totalorder %s526_s13, 0 }
   0x8   : > { %p90_p3 = scmp.eq.s32.totalorder %s288_s14, 1  ;;  %p289_p5 = scmp.ge.s32.totalorder %s485_s12, 1 }
   0x9   : > { %p535_p4 = por %p683_p1, %p39_p0  ;;  %p97_p7 = scmp.lt.s32.totalorder %s485_s12, 3 }
   0xa   : > { %p540_p6 = por %p90_p3, %p39_p0  ;;  %s487_s18 = smov [#allocation5]  }
   0xb   : > { %s687_s15 = scalar_select %p535_p4, 1, 0 }
   0xc   : > { %s688_s16 = scalar_select %p540_p6, 1, 0 }
   0xd   : > { %p545_p8 = pnand %p289_p5, %p97_p7  ;;  %s110_s19 = sshll.u32 %s487_s18, 4  ;;  %s111_s19 = int_to_ptr.vmem [resolvable:$true] %s110_s19 }
   0xe   : > { %s553_s20 = sadd.s32 1, %s485_s12   ;;  %s26_s24 = sadd.s32 1, %s481_s11 }
   0xf   : > { %s689_s17 = scalar_select %p545_p8, 1, 0 }
  0x10   : > { %p314_p10 = pneg %p545_p8  ;;  %s23_s22 = ssub.s32 %s485_s12, %s553_s20 }
  0x11   : > { %p563_p12 = scmp.eq.s32.totalorder %s23_s22, 0  ;;  %p33_p13 = scmp.ne.s32.totalorder %s481_s11, %s477_s10 }
  0x12   : > { %p557_p11 = pnand %p314_p10, %p683_p1  ;;  %s374_s25 = scalar_lea.vmem %s111_s19, 32 }
  0x13   : > { %p375_p3 = scmp.ne.s32.totalorder %s111_s19, %s374_s25  ;;  %p382_p9 = scmp.lt.s32.totalorder %s111_s19, %s111_s19 }
  0x14   : > { %p365_p0 = pneg %p557_p11  ;;  %p383_p2 = scmp.lt.s32.totalorder %s374_s25, %s374_s25 }
  0x16   : > { %p377_p5 = pnand %p375_p3, %p365_p0  ;;  %p384_p10 = por %p383_p2, %p382_p9 }
  0x18   : > { %p378_p7 = pneg %p377_p5 }
  0x1a   : > { %p385_p1 = pnand %p384_p10, %p378_p7 }
  0x1c   : > { %388 = shalt.err (!%p385_p1)
}
  0x1d   : > { %317 = dma.hbm_to_vmem [thread:$0]  (!%p557_p11), %s681_s1, 32, %s111_s19, [#allocation6]  }
  0x1e   : > { %s580_s28 = scalar_select %p563_p12, %s481_s11, %s26_s24  }
  0x1f   : > { %p34_p1 = scmp.eq.s32.totalorder %s485_s12, 0  ;;  %p692_p2 = scmp.eq.s32.totalorder %s526_s13, 1 }
  0x20   : > { %p327_p0 = scmp.lt.s32.totalorder %s485_s12, 2  ;;  %s121_s30 = sand.u32 1, %s481_s11  }
  0x21   : > { %p588_p9 = por %p692_p2, %p33_p13  ;;  %p35_p3 = por %p34_p1, %p33_p13 }
  0x22   : > { %s292_s3 = sshll.u32 %s121_s30, 1  ;;  %s293_s4 = sshll.u32 %s485_s12, 5 }
  0x23   : > { %s693_s29 = scalar_select %p588_p9, 1, 0 }
  0x24   : > { %s601_s7 = scalar_lea.hbm %s680_s0, %s293_s4  ;;  %s125_s8 = scalar_lea.vmem [#allocation2], %s292_s3 }
  0x25   : > { %s132_s14 = sshll.u32 %s125_s8, 4  ;;  %p603_p11 = pnand %p327_p0, %p35_p3  ;;  %s133_s14 = int_to_ptr.vmem [resolvable:$true] %s132_s14 }
  0x26   : > { %s122_s19 = scalar_lea.sflag [#allocation3], %s121_s30  ;;  %s389_s21 = scalar_lea.hbm %s601_s7, 32 }
  0x27   : > { %p390_p12 = scmp.ne.s32.totalorder %s601_s7, %s389_s21  ;;  %p391_p13 = pneg %p603_p11 }
  0x28   : > { %s394_s24 = scalar_lea.hbm %s680_s0, 64  ;;  %p395_p10 = scmp.lt.s32.totalorder %s601_s7, %s680_s0 }
  0x29   : > { %p392_p5 = pnand %p391_p13, %p390_p12  ;;  %p396_p1 = scmp.lt.s32.totalorder %s394_s24, %s389_s21 }
  0x2b   : > { %p393_p7 = pneg %p392_p5  ;;  %p397_p2 = por %p396_p1, %p395_p10 }
  0x2d   : > { %p398_p0 = pnand %p397_p2, %p393_p7 }
  0x2f   : > { %401 = shalt.err (!%p398_p0)
}
  0x30   : > { %s402_s27 = scalar_lea.vmem %s133_s14, 32  ;;  %s488_s30 = smov [#allocation2]  }
  0x31   : > { %p403_p3 = scmp.ne.s32.totalorder %s133_s14, %s402_s27  ;;  %s407_s3 = sshll.u32 %s488_s30, 4  ;;  %s408_s3 = int_to_ptr.vmem [resolvable:$false] %s407_s3 }
  0x32   : > { %s409_s4 = scalar_lea.vmem %s408_s3, 64  ;;  %p410_p12 = scmp.lt.s32.totalorder %s133_s14, %s408_s3 }
  0x33   : > { %p405_p6 = pnand %p403_p3, %p391_p13  ;;  %p411_p5 = scmp.lt.s32.totalorder %s409_s4, %s402_s27 }
  0x35   : > { %p406_p9 = pneg %p405_p6  ;;  %p412_p4 = por %p411_p5, %p410_p12 }
  0x37   : > { %p413_p8 = pnand %p412_p4, %p406_p9 }
  0x39   : > { %416 = shalt.err (!%p413_p8)
}
  0x3a   : > { %321 = dma.hbm_to_vmem [thread:$0]  (!%p603_p11), %s601_s7, 32, %s133_s14, %s122_s19  }
  0x3b   : > { %p695_p7 = scmp.ne.s32.totalorder %s689_s17, 0 }
  0x3c   : > { %s624_s5 = sand.u32 (!%p695_p7), 1, %s477_s10   ;;  %p696_p6 = scmp.ne.s32.totalorder (!%p695_p7), %s687_s15, 0 }
  0x3d   : > { %141 = sbr.rel (%p695_p7) target bundleno = 100 (0x64), region = 28  ;;  %s295_s6 = sshll.u32 (!%p695_p7), %s624_s5, 1 }
  0x3e   : > { %s144_s8 = scalar_lea.sflag (!%p695_p7), [#allocation3], %s624_s5  ;;  %s147_s21 = scalar_lea.vmem (!%p695_p7), [#allocation2], %s295_s6 }
  0x42   : > { %460 = dma.done.wait (%p696_p6), %s144_s8, 32  }
  0x43   : > { %462 = vsyncadd (%p696_p6), %s144_s8, 4294967264  ;;  %p697_p4 = scmp.eq.s32.totalorder %s526_s13, 0 }
  0x45   : > { %464 = dma.done.wait (%p697_p4), [#allocation6], 32   ;;  %p698_p8 = pmov %p697_p4 }
  0x46   : > { %p172_p9 = scmp.lt.s32.totalorder %s526_s13, 0  ;;  %s173_s17 = ssub.s32 0, %s526_s13  ;;  %v186_v0 = vld [vmem:[%s147_s21] sm:$0x3] }
  0x47   : > { %466 = vsyncadd (%p698_p8), [#allocation6], 4294967264  ;;  %s298_s7 = smin.u32 %s526_s13, %s173_s17  ;;  %s171_s19 = scalar_lea.vmem [#allocation7], %s295_s6 }
  0x48   : > { %s175_s14 = sand.u32 1, %s298_s7   ;;  %s207_s22 = sshll.u32 %s171_s19, 4  ;;  %s640_s22 = int_to_ptr.vmem [resolvable:$true] %s207_s22 }
  0x49   : > { %s176_s18 = ssub.s32 0, %s175_s14  ;;  %s303_s23 = sshll.u32 %s526_s13, 5 }
  0x4a   : > { %s707_s18 = smov (!%p172_p9, %s176_s18), %s175_s14  ;;  %s205_s27 = scalar_lea.hbm %s682_s2, %s303_s23 }
  0x4b   : > { %p300_p11 = scmp.lt.s32.totalorder %s707_s18, 0  ;;  %s182_s15 = sadd.s32 2, %s707_s18 }
  0x4c   : > { %s194_s30 = scalar_lea.sflag [#allocation4], %s624_s5  ;;  %s417_s3 = scalar_lea.vmem %s640_s22, 32 }
  0x4d   : > { %s709_s15 = smov (!%p300_p11, %s182_s15), %s707_s18  ;;  %p418_p13 = scmp.ne.s32.totalorder %s640_s22, %s417_s3 }
  0x4e   : > { %s184_s24 = scalar_lea.vmem [#allocation5], %s709_s15  ;;  %p699_p10 = scmp.ne.s32.totalorder %s693_s29, 0 }
  0x4f   : > { %v301_v1 = vld [vmem:[%s184_s24] ss:$0 sm:$0xff]  ;;  %s489_s13 = smov [#allocation7]  }
  0x50   : > { %v191_v2 = vadd.f32 %v301_v1, %v186_v0  ;;  %p419_p1 = pnand %p418_p13, %p699_p10  ;;  %s421_s4 = sshll.u32 %s489_s13, 4  ;;  %s422_s4 = int_to_ptr.vmem [resolvable:$false] %s421_s4 }
  0x51   : > { %s423_s6 = scalar_lea.vmem %s422_s4, 64  ;;  %p424_p0 = scmp.lt.s32.totalorder %s640_s22, %s422_s4 }
  0x52   : > { %192 = vst [vmem:[%s171_s19] sm:$0x3] %v191_v2  ;;  %p420_p2 = pneg %p419_p1  ;;  %p425_p3 = scmp.lt.s32.totalorder %s423_s6, %s417_s3 }
  0x54   : > { %p426_p12 = por %p425_p3, %p424_p0 }
  0x56   : > { %p427_p5 = pnand %p426_p12, %p420_p2 }
  0x58   : > { %430 = shalt.err (!%p427_p5)
}
  0x59   : > { %s431_s8 = scalar_lea.hbm %s205_s27, 32  ;;  %s435_s17 = scalar_lea.hbm %s682_s2, 64 }
  0x5a   : > { %p432_p7 = scmp.ne.s32.totalorder %s205_s27, %s431_s8  ;;  %p436_p8 = scmp.lt.s32.totalorder %s205_s27, %s682_s2 }
  0x5b   : > { %p437_p9 = scmp.lt.s32.totalorder %s435_s17, %s431_s8 }
  0x5c   : > { %p433_p6 = pnand %p432_p7, %p699_p10 }
  0x5d   : > { %p438_p11 = por %p437_p9, %p436_p8 }
  0x5e   : > { %p434_p4 = pneg %p433_p6 }
  0x60   : > { %p439_p13 = pnand %p438_p11, %p434_p4 }
  0x62   : > { %442 = shalt.err (!%p439_p13)
}
  0x63   : > { %312 = dma.vmem_to_hbm [thread:$0]  (%p699_p10), %s640_s22, 32, %s205_s27, %s194_s30  }
  0x64 PF: > { %s219_s18 = sand.u32 1, %s473_s9   ;;  %p700_p1 = scmp.ne.s32.totalorder %s688_s16, 0 }
  0x65   : > { %p701_p2 = scmp.ge.s32.totalorder %s485_s12, 2  ;;  %s220_s15 = scalar_lea.sflag [#allocation4], %s219_s18 }
  0x67   : > { %p323_p0 = pnand %p701_p2, %p700_p1 }
  0x69   : > { %p324_p3 = pneg %p323_p0 }
  0x6b   : > { %468 = dma.done.wait (%p324_p3), %s220_s15, 32  }
  0x6c   : > { %470 = vsyncadd (%p324_p3), %s220_s15, 4294967264  ;;  %p16_p12 = scmp.ge.s32.totalorder %s553_s20, 4   ;;  %s702_s9 = smov %s477_s10 }
  0x6d   : > { %s703_s10 = smov %s481_s11  ;;  %s704_s11 = smov %s580_s28 }
  0x6e   : > { %s705_s12 = smov %s553_s20  ;;  %18 = sbr.rel (!%p16_p12) target bundleno = 6 (0x6), region = 78 }
  0x73   :  { %225 = vsyncpa [#allocation3], 1 }
  0x74   :  { %227 = vsyncpa [#allocation3 + $0x1], 1 }
  0x75   :  { %228 = vsyncpa [#allocation6], 1 }
  0x76   :  { %229 = vsyncpa [#allocation4], 1 }
  0x77   :  { %231 = vsyncpa [#allocation4 + $0x1], 1 }

</bundles_post_ra>
